<compile_context>
chip_gen: v7x
topology: tpu7x:2x2x1
jax: 0.10.0
libtpu: 0.0.40
codegen_flags: <defaults>
</compile_context>

<pallas_src>
import functools

import jax
import jax.numpy as jnp
from jax import lax
from jax.experimental import pallas as pl
from jax.experimental.pallas import tpu as pltpu


def _round_up(x, m):
    return (x + m - 1) // m * m


# ---------------------------------------------------------------------------
# Fast path: embedding table resident in VMEM; row gather = VMEM loads.
# ---------------------------------------------------------------------------
def _feel_resident_kernel(ids_ref, tab_ref, out_ref, *, BT, L, BpL, delta):
    """One grid step = BT batch elements; (Vp, Dp) table lives in VMEM."""
    t = pl.program_id(0)
    inv_l = jnp.float32(1.0 / L)

    @pl.loop(0, BT)
    def _(i):
        base = (t * BT + i) * L

        def branch_mean(s):
            acc = tab_ref[pl.ds(ids_ref[s * BpL + base], 1), :]
            for l in range(1, L):                 # static unroll over sequence
                acc = acc + tab_ref[pl.ds(ids_ref[s * BpL + base + l], 1), :]
            return acc * inv_l                    # (1, Dp)

        qm = branch_mean(0)
        pm = branch_mean(1)
        nm = branch_mean(2)
        a = jnp.sum(qm * pm, axis=1, keepdims=True)            # (1, 1)
        b = jnp.sum(qm * nm, axis=1, keepdims=True)             # (1, 1)
        val = jnp.maximum(jnp.float32(delta) - a + b, jnp.float32(0.0))
        # Lane-dense 128-wide row store into this element's output row.
        out_ref[pl.ds(i, 1), :] = jnp.broadcast_to(val, (1, 128))


# ---------------------------------------------------------------------------
# Slow path: table stays in HBM; manual row-gather DMAs double-buffered
# across grid steps.  Row j of a slot holds (branch s, token l, element i)
# with j = s*L*BT + l*BT + i, so the per-token partial sums are contiguous
# (BT, Dp) slabs (pure VALU adds, no reshapes).
# ---------------------------------------------------------------------------
def _feel_hbm_kernel(ids_ref, tab_hbm, out_ref, rows_ref, sem_ref, *,
                     BT, L, BpL, Dp, delta):
    t = pl.program_id(0)
    T = pl.num_programs(0)
    R = 3 * L * BT
    slot = lax.rem(t, 2)

    def issue(step, to_slot):
        # Issue all R row gathers for batch tile `step` into rows_ref[to_slot].
        for j in range(R):                        # static unroll
            s = j // (L * BT)
            rem = j % (L * BT)
            l = rem // BT
            i = rem % BT
            tok = ids_ref[s * BpL + (step * BT + i) * L + l]
            pltpu.make_async_copy(
                tab_hbm.at[pl.ds(tok, 1), :],
                rows_ref.at[to_slot, pl.ds(j, 1), :],
                sem_ref.at[to_slot],
            ).start()

    # Prime the pipeline: the very first tile has nothing in flight yet.
    @pl.when(t == 0)
    def _():
        issue(0, 0)

    # Prefetch the NEXT tile's rows into the other slot BEFORE waiting on the
    # current slot, so their HBM latency hides behind this step's work.
    # (All SMEM id reads happen ahead of any DMA wait.)
    @pl.when(t + 1 < T)
    def _():
        issue(t + 1, 1 - slot)

    # Wait for every row copy of the current slot (shared per-slot semaphore,
    # one matching wait per issued descriptor).
    for j in range(R):
        pltpu.make_async_copy(
            tab_hbm.at[pl.ds(0, 1), :],
            rows_ref.at[slot, pl.ds(j, 1), :],
            sem_ref.at[slot],
        ).wait()

    slab = rows_ref[slot]                                      # (R, Dp)
    inv_l = jnp.float32(1.0 / L)

    def branch_mean(s):
        base = s * L * BT
        acc = slab[base:base + BT, :]
        for l in range(1, L):                                  # static unroll
            acc = acc + slab[base + l * BT: base + (l + 1) * BT, :]
        return acc * inv_l                                     # (BT, Dp)

    qm = branch_mean(0)
    pm = branch_mean(1)
    nm = branch_mean(2)
    a = jnp.sum(qm * pm, axis=1, keepdims=True)                # (BT, 1)
    b = jnp.sum(qm * nm, axis=1, keepdims=True)                # (BT, 1)
    val = jnp.maximum(jnp.float32(delta) - a + b, jnp.float32(0.0))
    out_ref[...] = jnp.broadcast_to(val, (BT, 128))            # unmasked store


# ---------------------------------------------------------------------------
# Wrapper
# ---------------------------------------------------------------------------
def feel_model_intra(query, pos, neg, embeddings, delta=1.0, *,
                     block_batch=None, force_hbm_gather=False):
    """query/pos/neg: (B, L) int token ids; embeddings: (V, D) f32 -> (B,) f32."""
    B, L = query.shape
    V, D = embeddings.shape

    # Lane-align the embedding dim; sublane-align the vocab. Zero padding is
    # inert for both the mean and the dot products.
    Dp = _round_up(max(D, 128), 128)
    Vp = _round_up(V, 8)
    tab = jnp.zeros((Vp, Dp), jnp.float32).at[:V, :D].set(
        embeddings.astype(jnp.float32))
    table_bytes = Vp * Dp * 4

    # Generation-aware VMEM budget (v7x: 64 MiB/TC, v5e/v6e: 128 MiB).
    try:
        info = pltpu.get_tpu_info()
        vmem_cap = int(getattr(info, "vmem_capacity_bytes", 64 * 1024 * 1024))
    except Exception:
        vmem_cap = 64 * 1024 * 1024          # conservative = v7x per-TC VMEM
    # 2x table for BlockSpec buffering of the resident block, plus headroom.
    resident_budget = min(int(0.75 * vmem_cap), 100 * 1024 * 1024)
    use_resident = (not force_hbm_gather) and (2 * table_bytes <= resident_budget)

    # Batch tile size (multiple of 8 for clean (BT,128) output blocks).
    if block_batch is None:
        block_batch = 64 if use_resident else 8
    BT = min(_round_up(B, 8), _round_up(block_batch, 8))
    Bp = _round_up(B, BT)
    T = Bp // BT
    BpL = Bp * L

    # Flat int32 id vector for SMEM scalar prefetch; clamp like jnp's gather.
    ids = jnp.stack([query, pos, neg]).astype(jnp.int32)       # (3, B, L)
    ids = jnp.clip(ids, 0, V - 1)
    ids = jnp.pad(ids, ((0, 0), (0, Bp - B), (0, 0)))          # (3, Bp, L)
    ids = ids.reshape(-1)                                      # (3*Bp*L,)

    out_shape = jax.ShapeDtypeStruct((Bp, 128), jnp.float32)
    out_spec = pl.BlockSpec((BT, 128), lambda t, ids_r: (t, 0))

    if use_resident:
        kernel = functools.partial(_feel_resident_kernel, BT=BT, L=L,
                                   BpL=BpL, delta=float(delta))
        grid_spec = pltpu.PrefetchScalarGridSpec(
            num_scalar_prefetch=1,
            grid=(T,),
            in_specs=[pl.BlockSpec((Vp, Dp), lambda t, ids_r: (0, 0))],
            out_specs=out_spec,
        )
        vmem_limit = max(32 << 20, 2 * table_bytes + (8 << 20))
        dims = ("parallel",)
        bytes_accessed = table_bytes + ids.size * 4 + Bp * 128 * 4
    else:
        kernel = functools.partial(_feel_hbm_kernel, BT=BT, L=L, BpL=BpL,
                                   Dp=Dp, delta=float(delta))
        grid_spec = pltpu.PrefetchScalarGridSpec(
            num_scalar_prefetch=1,
            grid=(T,),
            in_specs=[pl.BlockSpec(memory_space=pl.ANY)],   # table stays in HBM
            out_specs=out_spec,
            scratch_shapes=[
                pltpu.VMEM((2, 3 * L * BT, Dp), jnp.float32),   # 2 gather slots
                pltpu.SemaphoreType.DMA((2,)),                  # 1 sem per slot
            ],
        )
        rows_bytes = 2 * 3 * L * BT * Dp * 4
        vmem_limit = max(32 << 20, rows_bytes + (8 << 20))
        # Grid steps carry in-flight DMA state (cross-step double buffering),
        # so this axis must be "arbitrary", not "parallel".
        dims = ("arbitrary",)
        bytes_accessed = 3 * Bp * L * (Dp * 4 + 4) + Bp * 128 * 4

    vmem_limit = int(min(vmem_limit, int(0.9 * vmem_cap)))

    out = pl.pallas_call(
        kernel,
        out_shape=out_shape,
        grid_spec=grid_spec,
        compiler_params=pltpu.CompilerParams(
            dimension_semantics=dims,
            vmem_limit_bytes=vmem_limit,
        ),
        cost_estimate=pl.CostEstimate(
            flops=int(Bp * (3 * L * Dp + 4 * Dp + 4)),
            transcendentals=0,
            bytes_accessed=int(bytes_accessed),
        ),
    )(ids, tab)

    return out[:B, 0]


def feel_model_intra_ref(query, pos, neg, embeddings, delta=1.0):
    q = embeddings[query].mean(axis=1)
    p = embeddings[pos].mean(axis=1)
    n = embeddings[neg].mean(axis=1)
    a = jnp.sum(q * p, axis=1)
    b = jnp.sum(q * n, axis=1)
    return jax.nn.relu(delta - a + b)


if __name__ == "__main__":
    VOCAB = 64
    EMB_DIM = 32
    B = 2
    L = 8
    DELTA = 1.0

    key = jax.random.PRNGKey(0)
    k_emb, k_q, k_p, k_n = jax.random.split(key, 4)

    # nn.Embedding(vocab_size, embedding_dim) default init ~ N(0, 1).
    embeddings = jax.random.normal(k_emb, (VOCAB, EMB_DIM), dtype=jnp.float32)
    query = jax.random.randint(k_q, (B, L), 0, VOCAB, dtype=jnp.int32)
    pos = jax.random.randint(k_p, (B, L), 0, VOCAB, dtype=jnp.int32)
    neg = jax.random.randint(k_n, (B, L), 0, VOCAB, dtype=jnp.int32)

    # Primary check: VMEM-resident-table fast path.
    out = jax.block_until_ready(
        feel_model_intra(query, pos, neg, embeddings, delta=DELTA))
    ref = feel_model_intra_ref(query, pos, neg, embeddings, delta=DELTA)
    assert out.shape == (B,), out.shape
    assert jnp.allclose(out, ref, atol=1e-4, rtol=1e-4), (out, ref)

    # Secondary check: HBM-gather path with cross-step double buffering,
    # multiple batch tiles, and non-multiple-of-8 batch / dim.
    B2, L2, D2 = 13, 6, 48
    kk = jax.random.split(jax.random.PRNGKey(1), 4)
    emb2 = jax.random.normal(kk[0], (VOCAB, D2), dtype=jnp.float32)
    q2 = jax.random.randint(kk[1], (B2, L2), 0, VOCAB, dtype=jnp.int32)
    p2 = jax.random.randint(kk[2], (B2, L2), 0, VOCAB, dtype=jnp.int32)
    n2 = jax.random.randint(kk[3], (B2, L2), 0, VOCAB, dtype=jnp.int32)
    out2 = jax.block_until_ready(
        feel_model_intra(q2, p2, n2, emb2, delta=0.5,
                         force_hbm_gather=True, block_batch=8))
    ref2 = feel_model_intra_ref(q2, p2, n2, emb2, delta=0.5)
    assert out2.shape == (B2,), out2.shape
    assert jnp.allclose(out2, ref2, atol=1e-4, rtol=1e-4), (out2, ref2)

    print("KERNEL_OK")
</pallas_src>

<mosaic_0001>
module attributes {stable_mosaic.version = 11 : i64} {
  func.func @_feel_resident_kernel(%arg0: i32, %arg1: memref<192xi32, #tpu.memory_space<smem>>, %arg2: memref<64x128xf32, #tpu.memory_space<vmem>>, %arg3: memref<8x128xf32, #tpu.memory_space<vmem>>) attributes {dimension_semantics = [#tpu.dimension_semantics<parallel>], iteration_bounds = array<i64: 1>, scalar_prefetch = 1 : i64, scratch_operands = 0 : i64, tpu.core_type = #tpu.core_type<tc>, window_params = [{pipeline_mode = #tpu.pipeline_mode<synchronous>, transform_indices = @transform_0, window_bounds = array<i64: 64, 128>}, {transform_indices = @transform_1, window_bounds = array<i64: 8, 128>}]} {
    %cst = arith.constant 1.250000e-01 : f32
    %c0_i32 = arith.constant 0 : i32
    %c8_i32 = arith.constant 8 : i32
    %0 = arith.addi %c0_i32, %c8_i32 : i32
    %c1_i32 = arith.constant 1 : i32
    scf.for %arg4 = %c0_i32 to %0 step %c1_i32  : i32 {
      %c1_i32_1 = arith.constant 1 : i32
      %1 = arith.muli %arg4, %c1_i32_1 : i32
      %c0_i32_2 = arith.constant 0 : i32
      %2 = arith.addi %c0_i32_2, %1 : i32
      %c8_i32_3 = arith.constant 8 : i32
      %3 = arith.muli %arg0, %c8_i32_3 : i32
      %4 = arith.addi %3, %2 : i32
      %c8_i32_4 = arith.constant 8 : i32
      %5 = arith.muli %4, %c8_i32_4 : i32
      %c0_i32_5 = arith.constant 0 : i32
      %6 = arith.addi %c0_i32_5, %5 : i32
      %7 = arith.index_cast %6 : i32 to index
      %8 = memref.load %arg1[%7] : memref<192xi32, #tpu.memory_space<smem>>
      %9 = arith.index_cast %8 : i32 to index
      %c0 = arith.constant 0 : index
      %10 = vector.load %arg2[%9, %c0] : memref<64x128xf32, #tpu.memory_space<vmem>>, vector<1x128xf32>
      %c0_i32_6 = arith.constant 0 : i32
      %11 = arith.addi %c0_i32_6, %5 : i32
      %c1_i32_7 = arith.constant 1 : i32
      %12 = arith.addi %11, %c1_i32_7 : i32
      %13 = arith.index_cast %12 : i32 to index
      %14 = memref.load %arg1[%13] : memref<192xi32, #tpu.memory_space<smem>>
      %15 = arith.index_cast %14 : i32 to index
      %c0_8 = arith.constant 0 : index
      %16 = vector.load %arg2[%15, %c0_8] : memref<64x128xf32, #tpu.memory_space<vmem>>, vector<1x128xf32>
      %17 = arith.addf %10, %16 : vector<1x128xf32>
      %c0_i32_9 = arith.constant 0 : i32
      %18 = arith.addi %c0_i32_9, %5 : i32
      %c2_i32 = arith.constant 2 : i32
      %19 = arith.addi %18, %c2_i32 : i32
      %20 = arith.index_cast %19 : i32 to index
      %21 = memref.load %arg1[%20] : memref<192xi32, #tpu.memory_space<smem>>
      %22 = arith.index_cast %21 : i32 to index
      %c0_10 = arith.constant 0 : index
      %23 = vector.load %arg2[%22, %c0_10] : memref<64x128xf32, #tpu.memory_space<vmem>>, vector<1x128xf32>
      %24 = arith.addf %17, %23 : vector<1x128xf32>
      %c0_i32_11 = arith.constant 0 : i32
      %25 = arith.addi %c0_i32_11, %5 : i32
      %c3_i32 = arith.constant 3 : i32
      %26 = arith.addi %25, %c3_i32 : i32
      %27 = arith.index_cast %26 : i32 to index
      %28 = memref.load %arg1[%27] : memref<192xi32, #tpu.memory_space<smem>>
      %29 = arith.index_cast %28 : i32 to index
      %c0_12 = arith.constant 0 : index
      %30 = vector.load %arg2[%29, %c0_12] : memref<64x128xf32, #tpu.memory_space<vmem>>, vector<1x128xf32>
      %31 = arith.addf %24, %30 : vector<1x128xf32>
      %c0_i32_13 = arith.constant 0 : i32
      %32 = arith.addi %c0_i32_13, %5 : i32
      %c4_i32 = arith.constant 4 : i32
      %33 = arith.addi %32, %c4_i32 : i32
      %34 = arith.index_cast %33 : i32 to index
      %35 = memref.load %arg1[%34] : memref<192xi32, #tpu.memory_space<smem>>
      %36 = arith.index_cast %35 : i32 to index
      %c0_14 = arith.constant 0 : index
      %37 = vector.load %arg2[%36, %c0_14] : memref<64x128xf32, #tpu.memory_space<vmem>>, vector<1x128xf32>
      %38 = arith.addf %31, %37 : vector<1x128xf32>
      %c0_i32_15 = arith.constant 0 : i32
      %39 = arith.addi %c0_i32_15, %5 : i32
      %c5_i32 = arith.constant 5 : i32
      %40 = arith.addi %39, %c5_i32 : i32
      %41 = arith.index_cast %40 : i32 to index
      %42 = memref.load %arg1[%41] : memref<192xi32, #tpu.memory_space<smem>>
      %43 = arith.index_cast %42 : i32 to index
      %c0_16 = arith.constant 0 : index
      %44 = vector.load %arg2[%43, %c0_16] : memref<64x128xf32, #tpu.memory_space<vmem>>, vector<1x128xf32>
      %45 = arith.addf %38, %44 : vector<1x128xf32>
      %c0_i32_17 = arith.constant 0 : i32
      %46 = arith.addi %c0_i32_17, %5 : i32
      %c6_i32 = arith.constant 6 : i32
      %47 = arith.addi %46, %c6_i32 : i32
      %48 = arith.index_cast %47 : i32 to index
      %49 = memref.load %arg1[%48] : memref<192xi32, #tpu.memory_space<smem>>
      %50 = arith.index_cast %49 : i32 to index
      %c0_18 = arith.constant 0 : index
      %51 = vector.load %arg2[%50, %c0_18] : memref<64x128xf32, #tpu.memory_space<vmem>>, vector<1x128xf32>
      %52 = arith.addf %45, %51 : vector<1x128xf32>
      %c0_i32_19 = arith.constant 0 : i32
      %53 = arith.addi %c0_i32_19, %5 : i32
      %c7_i32 = arith.constant 7 : i32
      %54 = arith.addi %53, %c7_i32 : i32
      %55 = arith.index_cast %54 : i32 to index
      %56 = memref.load %arg1[%55] : memref<192xi32, #tpu.memory_space<smem>>
      %57 = arith.index_cast %56 : i32 to index
      %c0_20 = arith.constant 0 : index
      %58 = vector.load %arg2[%57, %c0_20] : memref<64x128xf32, #tpu.memory_space<vmem>>, vector<1x128xf32>
      %59 = arith.addf %52, %58 : vector<1x128xf32>
      %60 = vector.broadcast %cst : f32 to vector<1x128xf32>
      %61 = arith.mulf %59, %60 : vector<1x128xf32>
      %c64_i32 = arith.constant 64 : i32
      %62 = arith.addi %c64_i32, %5 : i32
      %63 = arith.index_cast %62 : i32 to index
      %64 = memref.load %arg1[%63] : memref<192xi32, #tpu.memory_space<smem>>
      %65 = arith.index_cast %64 : i32 to index
      %c0_21 = arith.constant 0 : index
      %66 = vector.load %arg2[%65, %c0_21] : memref<64x128xf32, #tpu.memory_space<vmem>>, vector<1x128xf32>
      %c64_i32_22 = arith.constant 64 : i32
      %67 = arith.addi %c64_i32_22, %5 : i32
      %c1_i32_23 = arith.constant 1 : i32
      %68 = arith.addi %67, %c1_i32_23 : i32
      %69 = arith.index_cast %68 : i32 to index
      %70 = memref.load %arg1[%69] : memref<192xi32, #tpu.memory_space<smem>>
      %71 = arith.index_cast %70 : i32 to index
      %c0_24 = arith.constant 0 : index
      %72 = vector.load %arg2[%71, %c0_24] : memref<64x128xf32, #tpu.memory_space<vmem>>, vector<1x128xf32>
      %73 = arith.addf %66, %72 : vector<1x128xf32>
      %c64_i32_25 = arith.constant 64 : i32
      %74 = arith.addi %c64_i32_25, %5 : i32
      %c2_i32_26 = arith.constant 2 : i32
      %75 = arith.addi %74, %c2_i32_26 : i32
      %76 = arith.index_cast %75 : i32 to index
      %77 = memref.load %arg1[%76] : memref<192xi32, #tpu.memory_space<smem>>
      %78 = arith.index_cast %77 : i32 to index
      %c0_27 = arith.constant 0 : index
      %79 = vector.load %arg2[%78, %c0_27] : memref<64x128xf32, #tpu.memory_space<vmem>>, vector<1x128xf32>
      %80 = arith.addf %73, %79 : vector<1x128xf32>
      %c64_i32_28 = arith.constant 64 : i32
      %81 = arith.addi %c64_i32_28, %5 : i32
      %c3_i32_29 = arith.constant 3 : i32
      %82 = arith.addi %81, %c3_i32_29 : i32
      %83 = arith.index_cast %82 : i32 to index
      %84 = memref.load %arg1[%83] : memref<192xi32, #tpu.memory_space<smem>>
      %85 = arith.index_cast %84 : i32 to index
      %c0_30 = arith.constant 0 : index
      %86 = vector.load %arg2[%85, %c0_30] : memref<64x128xf32, #tpu.memory_space<vmem>>, vector<1x128xf32>
      %87 = arith.addf %80, %86 : vector<1x128xf32>
      %c64_i32_31 = arith.constant 64 : i32
      %88 = arith.addi %c64_i32_31, %5 : i32
      %c4_i32_32 = arith.constant 4 : i32
      %89 = arith.addi %88, %c4_i32_32 : i32
      %90 = arith.index_cast %89 : i32 to index
      %91 = memref.load %arg1[%90] : memref<192xi32, #tpu.memory_space<smem>>
      %92 = arith.index_cast %91 : i32 to index
      %c0_33 = arith.constant 0 : index
      %93 = vector.load %arg2[%92, %c0_33] : memref<64x128xf32, #tpu.memory_space<vmem>>, vector<1x128xf32>
      %94 = arith.addf %87, %93 : vector<1x128xf32>
      %c64_i32_34 = arith.constant 64 : i32
      %95 = arith.addi %c64_i32_34, %5 : i32
      %c5_i32_35 = arith.constant 5 : i32
      %96 = arith.addi %95, %c5_i32_35 : i32
      %97 = arith.index_cast %96 : i32 to index
      %98 = memref.load %arg1[%97] : memref<192xi32, #tpu.memory_space<smem>>
      %99 = arith.index_cast %98 : i32 to index
      %c0_36 = arith.constant 0 : index
      %100 = vector.load %arg2[%99, %c0_36] : memref<64x128xf32, #tpu.memory_space<vmem>>, vector<1x128xf32>
      %101 = arith.addf %94, %100 : vector<1x128xf32>
      %c64_i32_37 = arith.constant 64 : i32
      %102 = arith.addi %c64_i32_37, %5 : i32
      %c6_i32_38 = arith.constant 6 : i32
      %103 = arith.addi %102, %c6_i32_38 : i32
      %104 = arith.index_cast %103 : i32 to index
      %105 = memref.load %arg1[%104] : memref<192xi32, #tpu.memory_space<smem>>
      %106 = arith.index_cast %105 : i32 to index
      %c0_39 = arith.constant 0 : index
      %107 = vector.load %arg2[%106, %c0_39] : memref<64x128xf32, #tpu.memory_space<vmem>>, vector<1x128xf32>
      %108 = arith.addf %101, %107 : vector<1x128xf32>
      %c64_i32_40 = arith.constant 64 : i32
      %109 = arith.addi %c64_i32_40, %5 : i32
      %c7_i32_41 = arith.constant 7 : i32
      %110 = arith.addi %109, %c7_i32_41 : i32
      %111 = arith.index_cast %110 : i32 to index
      %112 = memref.load %arg1[%111] : memref<192xi32, #tpu.memory_space<smem>>
      %113 = arith.index_cast %112 : i32 to index
      %c0_42 = arith.constant 0 : index
      %114 = vector.load %arg2[%113, %c0_42] : memref<64x128xf32, #tpu.memory_space<vmem>>, vector<1x128xf32>
      %115 = arith.addf %108, %114 : vector<1x128xf32>
      %116 = vector.broadcast %cst : f32 to vector<1x128xf32>
      %117 = arith.mulf %115, %116 : vector<1x128xf32>
      %c128_i32 = arith.constant 128 : i32
      %118 = arith.addi %c128_i32, %5 : i32
      %119 = arith.index_cast %118 : i32 to index
      %120 = memref.load %arg1[%119] : memref<192xi32, #tpu.memory_space<smem>>
      %121 = arith.index_cast %120 : i32 to index
      %c0_43 = arith.constant 0 : index
      %122 = vector.load %arg2[%121, %c0_43] : memref<64x128xf32, #tpu.memory_space<vmem>>, vector<1x128xf32>
      %c128_i32_44 = arith.constant 128 : i32
      %123 = arith.addi %c128_i32_44, %5 : i32
      %c1_i32_45 = arith.constant 1 : i32
      %124 = arith.addi %123, %c1_i32_45 : i32
      %125 = arith.index_cast %124 : i32 to index
      %126 = memref.load %arg1[%125] : memref<192xi32, #tpu.memory_space<smem>>
      %127 = arith.index_cast %126 : i32 to index
      %c0_46 = arith.constant 0 : index
      %128 = vector.load %arg2[%127, %c0_46] : memref<64x128xf32, #tpu.memory_space<vmem>>, vector<1x128xf32>
      %129 = arith.addf %122, %128 : vector<1x128xf32>
      %c128_i32_47 = arith.constant 128 : i32
      %130 = arith.addi %c128_i32_47, %5 : i32
      %c2_i32_48 = arith.constant 2 : i32
      %131 = arith.addi %130, %c2_i32_48 : i32
      %132 = arith.index_cast %131 : i32 to index
      %133 = memref.load %arg1[%132] : memref<192xi32, #tpu.memory_space<smem>>
      %134 = arith.index_cast %133 : i32 to index
      %c0_49 = arith.constant 0 : index
      %135 = vector.load %arg2[%134, %c0_49] : memref<64x128xf32, #tpu.memory_space<vmem>>, vector<1x128xf32>
      %136 = arith.addf %129, %135 : vector<1x128xf32>
      %c128_i32_50 = arith.constant 128 : i32
      %137 = arith.addi %c128_i32_50, %5 : i32
      %c3_i32_51 = arith.constant 3 : i32
      %138 = arith.addi %137, %c3_i32_51 : i32
      %139 = arith.index_cast %138 : i32 to index
      %140 = memref.load %arg1[%139] : memref<192xi32, #tpu.memory_space<smem>>
      %141 = arith.index_cast %140 : i32 to index
      %c0_52 = arith.constant 0 : index
      %142 = vector.load %arg2[%141, %c0_52] : memref<64x128xf32, #tpu.memory_space<vmem>>, vector<1x128xf32>
      %143 = arith.addf %136, %142 : vector<1x128xf32>
      %c128_i32_53 = arith.constant 128 : i32
      %144 = arith.addi %c128_i32_53, %5 : i32
      %c4_i32_54 = arith.constant 4 : i32
      %145 = arith.addi %144, %c4_i32_54 : i32
      %146 = arith.index_cast %145 : i32 to index
      %147 = memref.load %arg1[%146] : memref<192xi32, #tpu.memory_space<smem>>
      %148 = arith.index_cast %147 : i32 to index
      %c0_55 = arith.constant 0 : index
      %149 = vector.load %arg2[%148, %c0_55] : memref<64x128xf32, #tpu.memory_space<vmem>>, vector<1x128xf32>
      %150 = arith.addf %143, %149 : vector<1x128xf32>
      %c128_i32_56 = arith.constant 128 : i32
      %151 = arith.addi %c128_i32_56, %5 : i32
      %c5_i32_57 = arith.constant 5 : i32
      %152 = arith.addi %151, %c5_i32_57 : i32
      %153 = arith.index_cast %152 : i32 to index
      %154 = memref.load %arg1[%153] : memref<192xi32, #tpu.memory_space<smem>>
      %155 = arith.index_cast %154 : i32 to index
      %c0_58 = arith.constant 0 : index
      %156 = vector.load %arg2[%155, %c0_58] : memref<64x128xf32, #tpu.memory_space<vmem>>, vector<1x128xf32>
      %157 = arith.addf %150, %156 : vector<1x128xf32>
      %c128_i32_59 = arith.constant 128 : i32
      %158 = arith.addi %c128_i32_59, %5 : i32
      %c6_i32_60 = arith.constant 6 : i32
      %159 = arith.addi %158, %c6_i32_60 : i32
      %160 = arith.index_cast %159 : i32 to index
      %161 = memref.load %arg1[%160] : memref<192xi32, #tpu.memory_space<smem>>
      %162 = arith.index_cast %161 : i32 to index
      %c0_61 = arith.constant 0 : index
      %163 = vector.load %arg2[%162, %c0_61] : memref<64x128xf32, #tpu.memory_space<vmem>>, vector<1x128xf32>
      %164 = arith.addf %157, %163 : vector<1x128xf32>
      %c128_i32_62 = arith.constant 128 : i32
      %165 = arith.addi %c128_i32_62, %5 : i32
      %c7_i32_63 = arith.constant 7 : i32
      %166 = arith.addi %165, %c7_i32_63 : i32
      %167 = arith.index_cast %166 : i32 to index
      %168 = memref.load %arg1[%167] : memref<192xi32, #tpu.memory_space<smem>>
      %169 = arith.index_cast %168 : i32 to index
      %c0_64 = arith.constant 0 : index
      %170 = vector.load %arg2[%169, %c0_64] : memref<64x128xf32, #tpu.memory_space<vmem>>, vector<1x128xf32>
      %171 = arith.addf %164, %170 : vector<1x128xf32>
      %172 = vector.broadcast %cst : f32 to vector<1x128xf32>
      %173 = arith.mulf %171, %172 : vector<1x128xf32>
      %174 = arith.mulf %61, %117 : vector<1x128xf32>
      %cst_65 = arith.constant dense<0.000000e+00> : vector<1xf32>
      %175 = vector.multi_reduction <add>, %174, %cst_65 [1] : vector<1x128xf32> to vector<1xf32>
      %176 = vector.shape_cast %175 : vector<1xf32> to vector<1x1xf32>
      %177 = arith.mulf %61, %173 : vector<1x128xf32>
      %cst_66 = arith.constant dense<0.000000e+00> : vector<1xf32>
      %178 = vector.multi_reduction <add>, %177, %cst_66 [1] : vector<1x128xf32> to vector<1xf32>
      %179 = vector.shape_cast %178 : vector<1xf32> to vector<1x1xf32>
      %cst_67 = arith.constant 1.000000e+00 : f32
      %180 = vector.broadcast %cst_67 : f32 to vector<1x1xf32>
      %181 = arith.subf %180, %176 : vector<1x1xf32>
      %182 = arith.addf %181, %179 : vector<1x1xf32>
      %cst_68 = arith.constant 0.000000e+00 : f32
      %183 = vector.broadcast %cst_68 : f32 to vector<1x1xf32>
      %184 = arith.maximumf %182, %183 : vector<1x1xf32>
      %185 = vector.shape_cast %184 : vector<1x1xf32> to vector<1x1xf32>
      %186 = vector.broadcast %185 : vector<1x1xf32> to vector<1x128xf32>
      %187 = arith.index_cast %2 : i32 to index
      %c0_69 = arith.constant 0 : index
      %188 = vector.load %arg3[%187, %c0_69] : memref<8x128xf32, #tpu.memory_space<vmem>>, vector<1x128xf32>
      tpu.vector_store %arg3[%187, %c0_69], %186 {strides = array<i32>} : memref<8x128xf32, #tpu.memory_space<vmem>>, vector<1x128xf32>,
    }
    %c8_i32_0 = arith.constant 8 : i32
    return
  }
  func.func @transform_0(%arg0: i32, %arg1: memref<192xi32, #tpu.memory_space<smem>>) -> (i32, i32) {
    %c0_i32 = arith.constant 0 : i32
    %c0_i32_0 = arith.constant 0 : i32
    %c0_i32_1 = arith.constant 0 : i32
    return %c0_i32, %c0_i32_0 : i32, i32
  }
  func.func @transform_1(%arg0: i32, %arg1: memref<192xi32, #tpu.memory_space<smem>>) -> (i32, i32) {
    %c0_i32 = arith.constant 0 : i32
    %c0_i32_0 = arith.constant 0 : i32
    return %arg0, %c0_i32 : i32, i32
  }
}

</mosaic_0001>

<bundles_post_ra>
// kernel: tpu_custom_call.1
= control target key start
LH: loop header
LB: loop body
LE: loop exit
PB: predicated region body
PF: predicated region fallthrough
CT: control target
= control target key end

     0   :  { %s406_s0 = inlined_call_operand.hbm [shape: s32[192], index: 0, kind: input, shape index: {}]   ;;  %s407_s1 = inlined_call_operand.hbm [shape: f32[64,128], index: 1, kind: input, shape index: {}]   ;;  %s408_s2 = inlined_call_operand.hbm [shape: f32[8,128], index: 2, kind: output, shape index: {}]  }
   0x1   :  { %s229_s11 = scalar_lea.hbm %s406_s0, 32 }
   0x2   :  { %p230_p0 = scmp.ne.s32.totalorder %s406_s0, %s229_s11  ;;  %p233_p1 = scmp.lt.u32.totalorder %s229_s11, %s406_s0 }
   0x4   :  { %p235_p2 = pnand %p233_p1, %p230_p0 }
   0x6   :  { %238 = shalt.err (!%p235_p2)  }
   0x7   :  { %s297_s16 = smov [#allocation3]  }
   0x8   :  { %8 = dma.hbm_to_smem %s406_s0, 32, %s297_s16, [#allocation2] }
   0x9   :  { %287 = dma.done.wait [#allocation2], 32 }
   0xa   :  { %288 = vsyncadd [#allocation2], 4294967264 }
   0xb   :  { %10 = sfence }
   0xc   :  { %11 = vsyncpa [#allocation5], 0 }
   0xd   :  { %12 = vsyncpa [#allocation6], 0  ;;  %s298_s19 = smov [#allocation4]   ;;  %s239_s23 = scalar_lea.hbm %s407_s1, 1024 }
   0xe   :  { %s18_s20 = sshll.u32 %s298_s19, 4  ;;  %p240_p3 = scmp.ne.s32.totalorder %s407_s1, %s239_s23  ;;  %s19_s20 = int_to_ptr.vmem [resolvable:$true] %s18_s20 }
   0xf   :  { %p243_p4 = scmp.lt.u32.totalorder %s239_s23, %s407_s1 }
  0x11   :  { %p245_p5 = pnand %p243_p4, %p240_p3 }
  0x13   :  { %248 = shalt.err (!%p245_p5)
}
  0x14   :  { %s249_s0 = scalar_lea.vmem %s19_s20, 1024  ;;  %p254_p7 = scmp.lt.s32.totalorder %s19_s20, %s19_s20 }
  0x15   :  { %p250_p6 = scmp.ne.s32.totalorder %s19_s20, %s249_s0  ;;  %p255_p8 = scmp.lt.s32.totalorder %s249_s0, %s249_s0 }
  0x17   :  { %p256_p9 = por %p255_p8, %p254_p7 }
  0x19   :  { %p257_p10 = pnand %p256_p9, %p250_p6 }
  0x1b   :  { %260 = shalt.err (!%p257_p10)
}
  0x1c   :  { %s299_s28 = smov 128   ;;  %s300_s29 = smov 8  }
  0x1d   :  { %24 = dma.hbm_to_vmem [thread:$0]  %s407_s1, 1024, %s19_s20, [#allocation5], %s299_s28, %s299_s28, %s300_s29  }
  0x1e   :  { %289 = dma.done.wait [#allocation5], 1024  }
  0x1f   :  { %290 = vsyncadd [#allocation5], 4294966272  ;;  %s341_s4 = smov 0  }
  0x20 LB: > { %s347_s5 = sshll.u32 %s295_s4, 3  ;;  %vm157_vm0 = vcmask 1040384   ;;  %s295_s4 = sphi %s341_s4, %s33_s4  }
  0x21   : > { %s37_s1 = sld [smem:[#allocation3 + %s347_s5]]  ;;  %s40_s6 = sadd.s32 1, %s347_s5 }
  0x22   : > { %s41_s7 = sld [smem:[#allocation3 + %s40_s6]]  ;;  %s45_s8 = sadd.s32 2, %s347_s5 }
  0x23   : > { %s46_s9 = sld [smem:[#allocation3 + %s45_s8]]  ;;  %s50_s10 = sadd.s32 3, %s347_s5 }
  0x24   : > { %s51_s11 = sld [smem:[#allocation3 + %s50_s10]]  ;;  %s55_s12 = sadd.s32 4, %s347_s5 }
  0x25   : > { %s56_s13 = sld [smem:[#allocation3 + %s55_s12]]  ;;  %s60_s14 = sadd.s32 5, %s347_s5 }
  0x26   : > { %s355_s15 = sld [smem:[#allocation3 + %s60_s14]]  ;;  %s65_s16 = sadd.s32 6, %s347_s5 }
  0x27   : > { %s358_s17 = sld [smem:[#allocation3 + %s65_s16]]  ;;  %s38_s18 = scalar_lea.vmem [#allocation4], %s37_s1 }
  0x28   : > { %v39_v0 = vld [vmem:[%s38_s18] sm:$0x1]  ;;  %s70_s19 = sadd.s32 7, %s347_s5  ;;  %s42_s20 = scalar_lea.vmem [#allocation4], %s41_s7 }
  0x29   : > { %v43_v1 = vld [vmem:[%s42_s20] sm:$0x1]  ;;  %s361_s21 = sld [smem:[#allocation3 + %s70_s19]]  ;;  %s47_s22 = scalar_lea.vmem [#allocation4], %s46_s9 }
  0x2a   : > { %v44_v2 = vadd.f32 %v43_v1, %v39_v0  ;;  %v48_v3 = vld [vmem:[%s47_s22] sm:$0x1]  ;;  %s76_s23 = sadd.s32 64, %s347_s5  ;;  %s52_s24 = scalar_lea.vmem [#allocation4], %s51_s11 }
  0x2b   : > { %v53_v4 = vld [vmem:[%s52_s24] sm:$0x1]  ;;  %s77_s25 = sld [smem:[#allocation3 + %s76_s23]]  ;;  %s80_s26 = sadd.s32 65, %s347_s5 }
  0x2c   : > { %v49_v5 = vadd.f32 %v48_v3, %v44_v2  ;;  %s81_s27 = sld [smem:[#allocation3 + %s80_s26]]  ;;  %s57_s0 = scalar_lea.vmem [#allocation4], %s56_s13 }
  0x2d   : > { %v58_v7 = vld [vmem:[%s57_s0] sm:$0x1]  ;;  %s85_s28 = sadd.s32 66, %s347_s5  ;;  %s90_s29 = sadd.s32 67, %s347_s5 }
  0x2e   : > { %v54_v6 = vadd.f32 %v53_v4, %v49_v5  ;;  %s86_s30 = sld [smem:[#allocation3 + %s85_s28]]  ;;  %s95_s1 = sadd.s32 68, %s347_s5 }
  0x2f   : > { %s91_s3 = sld [smem:[#allocation3 + %s90_s29]]  ;;  %s62_s7 = scalar_lea.vmem [#allocation4], %s355_s15 }
  0x30   : > { %v59_v8 = vadd.f32 %v58_v7, %v54_v6  ;;  %s96_s6 = sld [smem:[#allocation3 + %s95_s1]]  ;;  %v63_v9 = vld [vmem:[%s62_s7] sm:$0x1]  ;;  %s100_s9 = sadd.s32 69, %s347_s5 }
  0x31   : > { %s78_s8 = scalar_lea.vmem [#allocation4], %s77_s25  ;;  %s105_s10 = sadd.s32 70, %s347_s5 }
  0x32   : > { %v79_v10 = vld [vmem:[%s78_s8] sm:$0x1]  ;;  %s101_s11 = sld [smem:[#allocation3 + %s100_s9]]  ;;  %s82_s12 = scalar_lea.vmem [#allocation4], %s81_s27  ;;  %v64_v12 = vadd.f32 %v63_v9, %v59_v8 }
  0x33   : > { %v83_v11 = vld [vmem:[%s82_s12] sm:$0x1]  ;;  %s371_s13 = sld [smem:[#allocation3 + %s105_s10]]  ;;  %s110_s14 = sadd.s32 71, %s347_s5 }
  0x34   : > { %v84_v13 = vadd.f32 %v83_v11, %v79_v10  ;;  %s374_s16 = sld [smem:[#allocation3 + %s110_s14]]  ;;  %s67_s18 = scalar_lea.vmem [#allocation4], %s358_s17 }
  0x35   : > { %v68_v14 = vld [vmem:[%s67_s18] sm:$0x1]  ;;  %s87_s15 = scalar_lea.vmem [#allocation4], %s86_s30  ;;  %s116_s19 = sadd.s32 128, %s347_s5 }
  0x36   : > { %v88_v15 = vld [vmem:[%s87_s15] sm:$0x1]  ;;  %s92_s20 = scalar_lea.vmem [#allocation4], %s91_s3  ;;  %s117_s22 = sld [smem:[#allocation3 + %s116_s19]]  ;;  %v69_v19 = vadd.f32 %v68_v14, %v64_v12 }
  0x37   : > { %v89_v16 = vadd.f32 %v88_v15, %v84_v13  ;;  %v93_v17 = vld [vmem:[%s92_s20] sm:$0x1]  ;;  %s97_s23 = scalar_lea.vmem [#allocation4], %s96_s6  ;;  %s120_s24 = sadd.s32 129, %s347_s5 }
  0x38   : > { %v98_v18 = vld [vmem:[%s97_s23] sm:$0x1]  ;;  %s125_s25 = sadd.s32 130, %s347_s5  ;;  %s121_s17 = sld [smem:[#allocation3 + %s120_s24]] }
  0x39   : > { %v94_v20 = vadd.f32 %v93_v17, %v89_v16  ;;  %s72_s26 = scalar_lea.vmem [#allocation4], %s361_s21  ;;  %s102_s27 = scalar_lea.vmem [#allocation4], %s101_s11 }
  0x3a   : > { %v73_v21 = vld [vmem:[%s72_s26] sm:$0x1]  ;;  %s126_s0 = sld [smem:[#allocation3 + %s125_s25]]  ;;  %s130_s28 = sadd.s32 131, %s347_s5 }
  0x3b   : > { %v103_v22 = vld [vmem:[%s102_s27] sm:$0x1]  ;;  %v99_v23 = vadd.f32 %v98_v18, %v94_v20  ;;  %s107_s29 = scalar_lea.vmem [#allocation4], %s371_s13  ;;  %s131_s30 = sld [smem:[#allocation3 + %s130_s28]]  ;;  %v74_v25 = vadd.f32 %v73_v21, %v69_v19 }
  0x3c   : > { %v108_v24 = vld [vmem:[%s107_s29] sm:$0x1]  ;;  %s135_s3 = sadd.s32 132, %s347_s5  ;;  %s112_s6 = scalar_lea.vmem [#allocation4], %s374_s16 }
  0x3d   : > { %v104_v26 = vadd.f32 %v103_v22, %v99_v23  ;;  %s136_s1 = sld [smem:[#allocation3 + %s135_s3]]  ;;  %v113_v27 = vld [vmem:[%s112_s6] sm:$0x1]  ;;  %s118_s7 = scalar_lea.vmem [#allocation4], %s117_s22  ;;  %v75_v31 = vmul.f32 0.125, %v74_v25 }
  0x3e   : > { %v119_v28 = vld [vmem:[%s118_s7] sm:$0x1]  ;;  %s140_s21 = sadd.s32 133, %s347_s5  ;;  %s145_s8 = sadd.s32 134, %s347_s5 }
  0x3f   : > { %v109_v29 = vadd.f32 %v108_v24, %v104_v26  ;;  %s141_s9 = sld [smem:[#allocation3 + %s140_s21]]  ;;  %s122_s10 = scalar_lea.vmem [#allocation4], %s121_s17 }
  0x40   : > { %v123_v30 = vld [vmem:[%s122_s10] sm:$0x1]  ;;  %s146_s11 = sld [smem:[#allocation3 + %s145_s8]]  ;;  %s127_s12 = scalar_lea.vmem [#allocation4], %s126_s0 }
  0x41   : > { %v114_v32 = vadd.f32 %v113_v27, %v109_v29  ;;  %v124_v33 = vadd.f32 %v123_v30, %v119_v28  ;;  %v128_v34 = vld [vmem:[%s127_s12] sm:$0x1]  ;;  %s150_s13 = sadd.s32 135, %s347_s5  ;;  %s132_s16 = scalar_lea.vmem [#allocation4], %s131_s30 }
  0x42   : > { %s151_s14 = sld [smem:[#allocation3 + %s150_s13]]  ;;  %v133_v37 = vld [vmem:[%s132_s16] sm:$0x1]  ;;  %s168_s20 = scalar_lea.vmem [#allocation7], %s295_s4 }
  0x43   : > { %v115_v35 = vmul.f32 0.125, %v114_v32  ;;  %v129_v36 = vadd.f32 %v128_v34, %v124_v33  ;;  %s137_s18 = scalar_lea.vmem [#allocation4], %s136_s1  ;;  %s33_s4 = sadd.s32 1, %s295_s4  }
  0x44   : > { %v138_v38 = vld [vmem:[%s137_s18] sm:$0x1]  ;;  %p30_p11 = scmp.ge.s32.totalorder %s33_s4, 8  }
  0x45   : > { %v156_v39 = vmul.f32 %v115_v35, %v75_v31  ;;  %v134_v40 = vadd.f32 %v133_v37, %v129_v36  ;;  %s142_s15 = scalar_lea.vmem [#allocation4], %s141_s9  ;;  %s301_s22 = smov (%p30_p11), [#allocation7]  }
  0x46   : > { %v143_v41 = vld [vmem:[%s142_s15] sm:$0x1]  ;;  %s147_s19 = scalar_lea.vmem [#allocation4], %s146_s11  ;;  %s176_s23 = sshll.u32 (%p30_p11), %s301_s22, 4  ;;  %s177_s23 = int_to_ptr.vmem [resolvable:$true] %s176_s23 }
  0x47   : > { %v158_v42 = vsel %vm157_vm0, %v156_v39, 0.0  ;;  %v139_v43 = vadd.f32 %v138_v38, %v134_v40  ;;  %v148_v44 = vld [vmem:[%s147_s19] sm:$0x1]  ;;  %s261_s24 = scalar_lea.vmem (%p30_p11), %s177_s23, 128  ;;  %p266_p13 = scmp.lt.s32.totalorder (%p30_p11), %s177_s23, %s177_s23 }
  0x48   : > { %159 = vadd.xlane.f32.xlu0 %v158_v42  ;;  %s152_s5 = scalar_lea.vmem [#allocation4], %s151_s14  ;;  %p262_p12 = scmp.ne.s32.totalorder (%p30_p11), %s177_s23, %s261_s24 }
  0x49   : > { %v144_v45 = vadd.f32 %v143_v41, %v139_v43  ;;  %v153_v46 = vld [vmem:[%s152_s5] sm:$0x1]  ;;  %p267_p0 = scmp.lt.s32.totalorder (%p30_p11), %s261_s24, %s261_s24 }
  0x4b   : > { %v149_v47 = vadd.f32 %v148_v44, %v144_v45  ;;  %p268_p1 = por (%p30_p11), %p267_p0, %p266_p13 }
  0x4d   : > { %v154_v48 = vadd.f32 %v153_v46, %v149_v47  ;;  %p269_p2 = pnand (%p30_p11), %p268_p1, %p262_p12 }
  0x4f   : > { %v155_v49 = vmul.f32 0.125, %v154_v48 }
  0x51   : > { %v161_v50 = vmul.f32 %v155_v49, %v75_v31 }
  0x53   : > { %v162_v51 = vsel %vm157_vm0, %v161_v50, 0.0 }
  0x54   : > { %163 = vadd.xlane.f32.xlu0 %v162_v51 }
  0xd5   : > { %v160_v52 = vpop.xlane.xlu0 %159 }
  0xd6   : > { %v165_v53 = vsub.f32 1.0, %v160_v52 }
  0xe0   :  { %32 = sbr.rel (!%p30_p11) target bundleno = 32 (0x20), region = 60 }
  0xe1   : > { %v164_v54 = vpop.xlane.xlu0 %163 }
  0xe2   : > { %v166_v55 = vadd.f32 %v165_v53, %v164_v54 }
  0xe4   : > { %v167_v56 = vmax.f32 %v166_v55, 0.0 }
  0xe6   : > { %169 = vst [vmem:[%s168_s20] sm:$0x1] %v167_v56 }
  0xe7   :  { %272 = shalt.err (!%p269_p2)
}
  0xe8   :  { %s273_s26 = scalar_lea.hbm %s408_s2, 128 }
  0xe9   :  { %p274_p3 = scmp.ne.s32.totalorder %s408_s2, %s273_s26  ;;  %p277_p4 = scmp.lt.u32.totalorder %s273_s26, %s408_s2 }
  0xeb   :  { %p279_p5 = pnand %p277_p4, %p274_p3 }
  0xed   :  { %282 = shalt.err (!%p279_p5)
}
  0xee   :  { %179 = dma.vmem_to_hbm [thread:$0]  %s177_s23, 128, %s408_s2, [#allocation6]  }
  0xef   :  { %291 = dma.done.wait [#allocation6], 128  }
  0xf0   :  { %292 = vsyncadd [#allocation6], 4294967168 }
  0xf1   :  { %183 = vsyncpa [#allocation5], 1 }
  0xf2   :  { %184 = vsyncpa [#allocation6], 1 }

</bundles_post_ra>
